<compile_context>
chip_gen: v7x
topology: tpu7x:2x2x1
jax: 0.10.0
libtpu: 0.0.40
codegen_flags: <defaults>
</compile_context>

<pallas_src>
import jax
import jax.numpy as jnp
from jax.experimental import pallas as pl
from jax.experimental.pallas import tpu as pltpu


def _gpls_kernel(g_ref, p_ref, l_ref, table_ref, out_ref):
    # g_ref/p_ref/l_ref: (tn, 1) int32 -- indices with per-table row offsets
    # table_ref:         (K_pad, dim) float32 -- block-diagonal combined table
    # out_ref:           (tn, dim)   float32
    tn = out_ref.shape[0]
    k = table_ref.shape[0]
    lane = jax.lax.broadcasted_iota(jnp.int32, (tn, k), 1)        # (tn, K)
    # The three index ranges are disjoint, so OR of the three one-hots equals
    # their sum; each row has exactly three hot lanes (group, period, ls rows).
    one_hot = (
        (lane == g_ref[...]) | (lane == p_ref[...]) | (lane == l_ref[...])
    ).astype(table_ref.dtype)                                     # (tn, K)
    out_ref[...] = jnp.dot(
        one_hot, table_ref[...], preferred_element_type=jnp.float32
    ).astype(out_ref.dtype)


def gpls_embedding(group, period, ls, g_table, p_table, l_table, *, tn=256):
    """group/period/ls: int [N]; tables: float32 [type_x, dim_x] -> [N, dim]."""
    n = group.shape[0]
    tg, dg = g_table.shape
    tp, dp = p_table.shape
    tl, dl = l_table.shape
    dim = dg + dp + dl

    # Combined block-diagonal table: one MXU matmul = three lookups + concat.
    k = tg + tp + tl
    k_pad = -(-k // 8) * 8  # sublane-align the contraction dim (padded rows are 0)
    table = jnp.zeros((k_pad, dim), dtype=g_table.dtype)
    table = table.at[:tg, :dg].set(g_table)
    table = table.at[tg:tg + tp, dg:dg + dp].set(p_table)
    table = table.at[tg + tp:tg + tp + tl, dg + dp:].set(l_table)

    # Effective node tile: large by default, clipped for small N, multiple of 8.
    tn_eff = min(tn, max(8, -(-n // 8) * 8))
    tn_eff = max(8, (tn_eff // 8) * 8)
    n_pad = -(-n // tn_eff) * tn_eff

    def col(idx, off):
        # Padding rows get index `off` (a padding_idx row of the combined
        # table); their output is sliced off below, so semantics are exact.
        c = idx.astype(jnp.int32) + jnp.int32(off)
        c = jnp.pad(c, (0, n_pad - n), constant_values=off)
        return c.reshape(n_pad, 1)

    gi = col(group, 0)
    pi = col(period, tg)
    li = col(ls, tg + tp)

    out = pl.pallas_call(
        _gpls_kernel,
        out_shape=jax.ShapeDtypeStruct((n_pad, dim), g_table.dtype),
        grid_spec=pltpu.PrefetchScalarGridSpec(
            num_scalar_prefetch=0,
            grid=(n_pad // tn_eff,),
            in_specs=[
                pl.BlockSpec((tn_eff, 1), lambda i: (i, 0)),
                pl.BlockSpec((tn_eff, 1), lambda i: (i, 0)),
                pl.BlockSpec((tn_eff, 1), lambda i: (i, 0)),
                pl.BlockSpec((k_pad, dim), lambda i: (0, 0)),
            ],
            out_specs=pl.BlockSpec((tn_eff, dim), lambda i: (i, 0)),
        ),
        compiler_params=pltpu.CompilerParams(
            dimension_semantics=("parallel",),
        ),
    )(gi, pi, li, table)
    return out[:n]


if __name__ == "__main__":
    # Module defaults: dim=128, type_group=18, type_period=7, type_ls=3,
    # dim_ratio_group=1/2, dim_ratio_period=1/4 -> dims 64 / 32 / 32.
    dim = 128
    type_group, type_period, type_ls = 18, 7, 3
    dim_group = int(dim * (1 / 2))
    dim_period = int(dim * (1 / 4))
    dim_ls = dim - dim_group - dim_period

    n_nodes = 20  # small "graph" with 20 atoms

    key = jax.random.PRNGKey(0)
    k_g, k_p, k_l, k_ig, k_ip, k_il = jax.random.split(key, 6)

    # nn.Embedding init ~ N(0, 1); padding_idx=0 -> row 0 zeroed.
    g_table = jax.random.normal(k_g, (type_group, dim_group), dtype=jnp.float32)
    p_table = jax.random.normal(k_p, (type_period, dim_period), dtype=jnp.float32)
    l_table = jax.random.normal(k_l, (type_ls, dim_ls), dtype=jnp.float32)
    g_table = g_table.at[0].set(0.0)
    p_table = p_table.at[0].set(0.0)
    l_table = l_table.at[0].set(0.0)

    group = jax.random.randint(k_ig, (n_nodes,), 0, type_group, dtype=jnp.int32)
    period = jax.random.randint(k_ip, (n_nodes,), 0, type_period, dtype=jnp.int32)
    ls = jax.random.randint(k_il, (n_nodes,), 0, type_ls, dtype=jnp.int32)
    # Include a fully-padded atom (all indices 0 -> all-zero embedding row).
    group = group.at[3].set(0)
    period = period.at[3].set(0)
    ls = ls.at[3].set(0)

    out = gpls_embedding(group, period, ls, g_table, p_table, l_table)
    out = jax.block_until_ready(out)

    # Reference: plain JAX gathers + concat (== torch.cat of three nn.Embedding).
    ref = jnp.concatenate(
        [jnp.take(g_table, group, axis=0),
         jnp.take(p_table, period, axis=0),
         jnp.take(l_table, ls, axis=0)],
        axis=1,
    )
    assert out.shape == (n_nodes, dim)
    assert jnp.allclose(out, ref, atol=1e-6), "mismatch vs reference gather+concat"
    assert jnp.allclose(out[3], 0.0), "padding_idx rows must be zero"

    # TODO(synk): the DGL graph ndata pop/assign bookkeeping has no Pallas
    # equivalent; the kernel implements the numerical forward (lookup + concat).
    print("KERNEL_OK")
</pallas_src>

<mosaic_0001>
module attributes {stable_mosaic.version = 11 : i64} {
  func.func @_gpls_kernel(%arg0: i32, %arg1: memref<24x1xi32, #tpu.memory_space<vmem>>, %arg2: memref<24x1xi32, #tpu.memory_space<vmem>>, %arg3: memref<24x1xi32, #tpu.memory_space<vmem>>, %arg4: memref<32x128xf32, #tpu.memory_space<vmem>>, %arg5: memref<24x128xf32, #tpu.memory_space<vmem>>) attributes {dimension_semantics = [#tpu.dimension_semantics<parallel>], iteration_bounds = array<i64: 1>, scalar_prefetch = 0 : i64, scratch_operands = 0 : i64, tpu.core_type = #tpu.core_type<tc>, window_params = [{transform_indices = @transform_0, window_bounds = array<i64: 24, 1>}, {transform_indices = @transform_1, window_bounds = array<i64: 24, 1>}, {transform_indices = @transform_2, window_bounds = array<i64: 24, 1>}, {pipeline_mode = #tpu.pipeline_mode<synchronous>, transform_indices = @transform_3, window_bounds = array<i64: 32, 128>}, {transform_indices = @transform_4, window_bounds = array<i64: 24, 128>}]} {
    %0 = tpu.iota {dimensions = array<i32: 1>} : vector<24x32xi32>
    %c0 = arith.constant 0 : index
    %c0_0 = arith.constant 0 : index
    %1 = vector.load %arg1[%c0, %c0_0] : memref<24x1xi32, #tpu.memory_space<vmem>>, vector<24x1xi32>
    %2 = vector.broadcast %1 : vector<24x1xi32> to vector<24x32xi32>
    %3 = arith.cmpi eq, %0, %2 : vector<24x32xi32>
    %c0_1 = arith.constant 0 : index
    %c0_2 = arith.constant 0 : index
    %4 = vector.load %arg2[%c0_1, %c0_2] : memref<24x1xi32, #tpu.memory_space<vmem>>, vector<24x1xi32>
    %5 = vector.broadcast %4 : vector<24x1xi32> to vector<24x32xi32>
    %6 = arith.cmpi eq, %0, %5 : vector<24x32xi32>
    %7 = arith.ori %3, %6 : vector<24x32xi1>
    %c0_3 = arith.constant 0 : index
    %c0_4 = arith.constant 0 : index
    %8 = vector.load %arg3[%c0_3, %c0_4] : memref<24x1xi32, #tpu.memory_space<vmem>>, vector<24x1xi32>
    %9 = vector.broadcast %8 : vector<24x1xi32> to vector<24x32xi32>
    %10 = arith.cmpi eq, %0, %9 : vector<24x32xi32>
    %11 = arith.ori %7, %10 : vector<24x32xi1>
    %12 = arith.extui %11 : vector<24x32xi1> to vector<24x32xi32>
    %13 = arith.sitofp %12 : vector<24x32xi32> to vector<24x32xf32>
    %c0_5 = arith.constant 0 : index
    %c0_6 = arith.constant 0 : index
    %14 = vector.load %arg4[%c0_5, %c0_6] : memref<32x128xf32, #tpu.memory_space<vmem>>, vector<32x128xf32>
    %cst = arith.constant dense<0.000000e+00> : vector<24x128xf32>
    %15 = tpu.matmul %13, %14, %cst {dimension_numbers = #tpu.dot_dimension_numbers<[1], [0], [0], [1], [0, 0, 1, 1], [], []>} : vector<24x32xf32>, vector<32x128xf32>, vector<24x128xf32> -> vector<24x128xf32>
    %c0_7 = arith.constant 0 : index
    %c0_8 = arith.constant 0 : index
    %16 = vector.load %arg5[%c0_7, %c0_8] : memref<24x128xf32, #tpu.memory_space<vmem>>, vector<24x128xf32>
    tpu.vector_store %arg5[%c0_7, %c0_8], %15 {strides = array<i32>} : memref<24x128xf32, #tpu.memory_space<vmem>>, vector<24x128xf32>,
    return
  }
  func.func @transform_0(%arg0: i32) -> (i32, i32) {
    %c0_i32 = arith.constant 0 : i32
    %c0_i32_0 = arith.constant 0 : i32
    return %arg0, %c0_i32 : i32, i32
  }
  func.func @transform_1(%arg0: i32) -> (i32, i32) {
    %c0_i32 = arith.constant 0 : i32
    %c0_i32_0 = arith.constant 0 : i32
    return %arg0, %c0_i32 : i32, i32
  }
  func.func @transform_2(%arg0: i32) -> (i32, i32) {
    %c0_i32 = arith.constant 0 : i32
    %c0_i32_0 = arith.constant 0 : i32
    return %arg0, %c0_i32 : i32, i32
  }
  func.func @transform_3(%arg0: i32) -> (i32, i32) {
    %c0_i32 = arith.constant 0 : i32
    %c0_i32_0 = arith.constant 0 : i32
    %c0_i32_1 = arith.constant 0 : i32
    return %c0_i32, %c0_i32_0 : i32, i32
  }
  func.func @transform_4(%arg0: i32) -> (i32, i32) {
    %c0_i32 = arith.constant 0 : i32
    %c0_i32_0 = arith.constant 0 : i32
    return %arg0, %c0_i32 : i32, i32
  }
}

</mosaic_0001>

<bundles_post_ra>
// kernel: tpu_custom_call.1
= control target key start
LH: loop header
LB: loop body
LE: loop exit
PB: predicated region body
PF: predicated region fallthrough
CT: control target
= control target key end

     0   :  { %v263_v2 = vmov 0   ;;  %v264_v5 = vmov 0.0|0.0   ;;  %s352_s0 = inlined_call_operand.vmem [shape: s32[24,1], index: 0, kind: input, shape index: {}]   ;;  %s353_s1 = inlined_call_operand.vmem [shape: s32[24,1], index: 1, kind: input, shape index: {}]   ;;  %s354_s2 = inlined_call_operand.vmem [shape: s32[24,1], index: 2, kind: input, shape index: {}]   ;;  %s355_s3 = inlined_call_operand.vmem [shape: f32[32,128], index: 3, kind: input, shape index: {}]   ;;  %s356_s4 = inlined_call_operand.hbm [shape: f32[24,128], index: 4, kind: output, shape index: {}]  }
   0x1   :  { %v54_v0 = vld [vmem:[%s354_s2 + $0x8] sm:$0xff]  ;;  %238 = vset.pattern.permute.xlu1 %v263_v2  ;;  %237 = vset.pattern.permute.xlu0 %v263_v2  ;;  %v20_v4 = vld [vmem:[%s352_s0] sm:$0xff] }
   0x2   :  { %v21_v1 = vld [vmem:[%s352_s0 + $0x8] sm:$0xff]  ;;  %60 = vperm.xlu1 %238, %v54_v0   ;;  %226 = vmatprep.subr.bf16.mxu1 %v264_v5  ;;  %v77_v6 = vld [vmem:[%s355_s3] sm:$0xff] }
   0x3   :  { %27 = vperm.xlu0 %237, %v21_v1   ;;  %v36_v3 = vld [vmem:[%s353_s1 + $0x8] sm:$0xff]  ;;  %220 = vmatprep.subr.bf16.mxu0 %v264_v5 }
   0x4   :  { %v78_v7 = vld [vmem:[%s355_s3 + $0x8] sm:$0xff] }
   0x5   :  { %9 = vsyncpa [#allocation3], 0  ;;  %v221_v8 = vpack.c.bf16 %v78_v7, %v77_v6  ;;  %v79_v9 = vld [vmem:[%s355_s3 + $0x10] sm:$0xff]  ;;  %v80_v10 = vld [vmem:[%s355_s3 + $0x18] sm:$0xff]  ;;  %vm265_vm0 = vmmov 0   ;;  %v266_v14 = vmov 0.0   ;;  %v18_v18 = vlaneseq }
   0x6   :  { %24 = vperm.xlu1 %238, %v20_v4   ;;  %v22_v11 = vld [vmem:[%s352_s0 + $0x10] sm:$0xff]  ;;  %v35_v12 = vld [vmem:[%s353_s1] sm:$0xff]  ;;  %v224_v13 = vpack.c.bf16 %v80_v10, %v79_v9  ;;  %214 = vmatprep.mubr.msk.f32.mxu1 %vm265_vm0, %v266_v14  ;;  %vm81_vm5 = vcmask 261120  }
   0x7   :  { %42 = vperm.xlu0 %237, %v36_v3   ;;  %228 = vmatpush3.bf16.msra.mxu1 %v221_v8  ;;  %v37_v15 = vld [vmem:[%s353_s1 + $0x10] sm:$0xff]  ;;  %v53_v16 = vld [vmem:[%s354_s2] sm:$0xff]  ;;  %v19_v21 = vand.u32 127, %v18_v18  ;;  %s267_s1 = smov [#allocation2]  }
   0x8   :  { %222 = vmatpush3.bf16.msra.mxu0 %v221_v8  ;;  %227 = vmatprep.subr.bf16.mxu1 %v264_v5  ;;  %v55_v17 = vld [vmem:[%s354_s2 + $0x10] sm:$0xff]  ;;  %s179_s2 = sshll.u32 %s267_s1, 4  ;;  %s180_s2 = int_to_ptr.vmem [resolvable:$true] %s179_s2 }
   0x9   :  { %223 = vmatprep.subr.bf16.mxu0 %v264_v5  ;;  %211 = vmatprep.mubr.msk.f32.mxu0 %vm265_vm0, %v266_v14  ;;  %s239_s13 = scalar_lea.vmem %s180_s2, 384  ;;  %p244_p1 = scmp.lt.s32.totalorder %s180_s2, %s180_s2 }
   0xa   :  { %39 = vperm.xlu1 %238, %v35_v12   ;;  %p240_p0 = scmp.ne.s32.totalorder %s180_s2, %s239_s13  ;;  %p245_p2 = scmp.lt.s32.totalorder %s239_s13, %s239_s13 }
   0xb   :  { %30 = vperm.xlu0 %237, %v22_v11   ;;  %229 = vmatpush3.bf16.msra.mxu1 %v224_v13 }
   0xc   :  { %225 = vmatpush3.bf16.msra.mxu0 %v224_v13  ;;  %p246_p3 = por %p245_p2, %p244_p1 }
   0xe   :  { %57 = vperm.xlu1 %238, %v53_v16   ;;  %p247_p4 = pnand %p246_p3, %p240_p0 }
   0xf   :  { %45 = vperm.xlu0 %237, %v37_v15  }
  0x13   :  { %63 = vperm.xlu0 %237, %v55_v17  }
  0x81   :  { %v61_v19 = vpop.permute.xlu1 %60 }
  0x82   :  { %v28_v20 = vpop.permute.xlu0 %27  ;;  %vm66_vm1 = vcmp.eq.s32.totalorder %v19_v21, %v61_v19 }
  0x83   :  { %vm33_vm2 = vcmp.eq.s32.totalorder %v19_v21, %v28_v20 }
  0x85   :  { %v25_v23 = vpop.permute.xlu1 %24 }
  0x86   :  { %v43_v22 = vpop.permute.xlu0 %42  ;;  %vm32_vm8 = vcmp.eq.s32.totalorder %v19_v21, %v25_v23 }
  0x87   :  { %vm48_vm3 = vcmp.eq.s32.totalorder %v19_v21, %v43_v22 }
  0x88   :  { %vm51_vm4 = vmor %vm33_vm2, %vm48_vm3 }
  0x89   :  { %vm69_vm6 = vmor %vm51_vm4, %vm66_vm1  ;;  %v40_v25 = vpop.permute.xlu1 %39 }
  0x8a   :  { %v31_v24 = vpop.permute.xlu0 %30  ;;  %v191_v26 = vsel %vm69_vm6, 1.0, %v266_v14  ;;  %vm47_vm7 = vcmp.eq.s32.totalorder %v19_v21, %v40_v25 }
  0x8b   :  { %215 = vmatmul.mubr.msk.f32.vlgmr.msra.gmra.mrb[0].mxu1 %vm81_vm5, %v191_v26  ;;  %vm50_vm10 = vmor %vm32_vm8, %vm47_vm7  ;;  %vm34_vm13 = vcmp.eq.s32.totalorder %v19_v21, %v31_v24 }
  0x8c   :  { %217 = vmatprep.mubr.msk.f32.mxu1 %vm265_vm0, %v266_v14 }
  0x8d   :  { %v58_v28 = vpop.permute.xlu1 %57 }
  0x8e   :  { %v46_v27 = vpop.permute.xlu0 %45  ;;  %vm65_vm9 = vcmp.eq.s32.totalorder %v19_v21, %v58_v28 }
  0x8f   :  { %vm49_vm11 = vcmp.eq.s32.totalorder %v19_v21, %v46_v27  ;;  %vm68_vm12 = vmor %vm50_vm10, %vm65_vm9 }
  0x90   :  { %v190_v29 = vsel %vm68_vm12, 1.0, %v266_v14  ;;  %vm52_vm14 = vmor %vm34_vm13, %vm49_vm11 }
  0x91   :  { %212 = vmatmul.mubr.msk.f32.vlgmr.msra.gmra.mrb[0].mxu0 %vm81_vm5, %v190_v29 }
  0x92   :  { %v64_v30 = vpop.permute.xlu0 %63 }
  0x93   :  { %vm67_vm15 = vcmp.eq.s32.totalorder %v19_v21, %v64_v30 }
  0x94   :  { %vm70_vm1 = vmor %vm52_vm14, %vm67_vm15 }
  0x95   :  { %v192_v31 = vsel %vm70_vm1, 1.0, %v266_v14 }
  0x96   :  { %218 = vmatmul.mubr.msk.f32.gmra.mrb[2].mxu1 %vm81_vm5, %v192_v31 }
 0x15e   :  { %v162_v32 = vpop.f32.mrb[0].mxu1 }
 0x15f   :  { %172 = vst [vmem:[#allocation2 + $0x8] sm:$0xff] %v162_v32  ;;  %v216_v33 = vpop.f32.mrb[1].mxu1 }
 0x164   :  { %v157_v34 = vpop.f32.mrb[0].mxu0 }
 0x165   :  { %171 = vst [vmem:[#allocation2] sm:$0xff] %v157_v34  ;;  %v213_v35 = vpop.f32.mrb[1].mxu0 }
 0x169   :  { %v167_v36 = vpop.f32.mrb[2].mxu1 }
 0x16a   :  { %173 = vst [vmem:[#allocation2 + $0x10] sm:$0xff] %v167_v36  ;;  %v219_v37 = vpop.f32.mrb[3].mxu1 }
 0x16b   :  { %250 = shalt.err (!%p247_p4)
}
 0x16c   :  { %s251_s16 = scalar_lea.hbm %s356_s4, 384 }
 0x16d   :  { %p252_p5 = scmp.ne.s32.totalorder %s356_s4, %s251_s16  ;;  %p255_p6 = scmp.lt.u32.totalorder %s251_s16, %s356_s4 }
 0x16f   :  { %p257_p7 = pnand %p255_p6, %p252_p5 }
 0x171   :  { %260 = shalt.err (!%p257_p7)
}
 0x172   :  { %s268_s21 = smov 128   ;;  %s269_s22 = smov 8  }
 0x173   :  { %185 = dma.vmem_to_hbm [thread:$0]  %s180_s2, 384, %s356_s4, [#allocation3], %s268_s21, %s268_s21, %s269_s22  }
 0x174   :  { %261 = dma.done.wait [#allocation3], 384  }
 0x175   :  { %262 = vsyncadd [#allocation3], 4294966912 }
 0x176   :  { %189 = vsyncpa [#allocation3], 1 }

</bundles_post_ra>
